<compile_context>
chip_gen: v5e
topology: v5e:2x2
jax: 0.10.0
libtpu: 0.0.40
codegen_flags: <defaults>
</compile_context>

<pallas_src>
import jax
import jax.numpy as jnp
from jax.experimental import pallas as pl
from jax.experimental.pallas import tpu as pltpu

S_DIM = 6
A_DIM = 4
IN_DIM = S_DIM + A_DIM      # 10
HIDDEN = 30


def cnet_kernel(xT_ref, w1T_ref, b1T_ref, woT_ref, bo_ref, o_ref):
    # hidden = relu(W1^T @ x^T + b1^T)  -> (HIDDEN, TB), batch on the lane axis
    h = jnp.dot(w1T_ref[...], xT_ref[...], preferred_element_type=jnp.float32)
    net = jnp.maximum(h + b1T_ref[...], 0.0)
    # out = wo^T @ net + bo             -> (1, TB), lane-dense store
    o_ref[...] = (jnp.dot(woT_ref[...], net, preferred_element_type=jnp.float32)
                  + bo_ref[0, 0])


def cnet_forward(s, a, params, *, batch_tile=1024):
    """s: (B, S_DIM) f32, a: (B, A_DIM) f32 -> (B, 1) f32."""
    ws, bs, wa, ba, wo, bo = params
    B = s.shape[0]

    # --- wrapper-side fusion (free, correctness-preserving) ---
    x = jnp.concatenate([s, a], axis=1).astype(jnp.float32)       # (B, IN_DIM)
    w1T = jnp.concatenate([ws, wa], axis=0).T                     # (HIDDEN, IN_DIM)
    b1T = (bs + ba).reshape(1, HIDDEN).T                          # (HIDDEN, 1)
    woT = wo.reshape(HIDDEN, 1).T                                 # (1, HIDDEN)
    bo_s = bo.reshape(1, 1).astype(jnp.float32)                   # SMEM scalar

    # --- transposed (batch-on-lanes) layout, lane-aligned batch tile ---
    TB = min(batch_tile, pl.cdiv(B, 128) * 128)                   # multiple of 128
    B_pad = pl.cdiv(B, TB) * TB
    xT = jnp.pad(x, ((0, B_pad - B), (0, 0))).T                   # (IN_DIM, B_pad)

    outT = pl.pallas_call(
        cnet_kernel,
        out_shape=jax.ShapeDtypeStruct((1, B_pad), jnp.float32),
        grid=(B_pad // TB,),
        in_specs=[
            pl.BlockSpec((IN_DIM, TB), lambda i: (0, i)),         # x^T  : batch-tiled
            pl.BlockSpec((HIDDEN, IN_DIM), lambda i: (0, 0)),     # W1^T : VMEM-resident
            pl.BlockSpec((HIDDEN, 1), lambda i: (0, 0)),          # b1^T : VMEM-resident
            pl.BlockSpec((1, HIDDEN), lambda i: (0, 0)),          # wo^T : VMEM-resident
            pl.BlockSpec(memory_space=pltpu.SMEM),                # bo   : scalar in SMEM
        ],
        out_specs=pl.BlockSpec((1, TB), lambda i: (0, i)),        # lane-dense output
        compiler_params=pltpu.CompilerParams(
            dimension_semantics=("parallel",)),
    )(xT, w1T, b1T, woT, bo_s)

    return outT[0, :B].reshape(B, 1)


def init_params(key):
    """Deterministic init matching CNet.__init__ shapes.

    PyTorch stores Linear weight as (out, in); we keep the transposed
    (in, out) form. Weights ~ N(0, 0.1); bias values are synthetic
    (no checkpoint load).
    """
    k1, k2, k3, k4, k5, k6 = jax.random.split(key, 6)
    ws = 0.1 * jax.random.normal(k1, (S_DIM, HIDDEN), jnp.float32)
    bs = (1.0 / jnp.sqrt(S_DIM)) * (2 * jax.random.uniform(k2, (1, HIDDEN)) - 1)
    wa = 0.1 * jax.random.normal(k3, (A_DIM, HIDDEN), jnp.float32)
    ba = (1.0 / jnp.sqrt(A_DIM)) * (2 * jax.random.uniform(k4, (1, HIDDEN)) - 1)
    wo = 0.1 * jax.random.normal(k5, (HIDDEN, 1), jnp.float32)
    bo = (1.0 / jnp.sqrt(HIDDEN)) * (2 * jax.random.uniform(k6, (1, 1)) - 1)
    return (ws, bs.astype(jnp.float32), wa, ba.astype(jnp.float32),
            wo, bo.astype(jnp.float32))


def cnet_reference(s, a, params):
    ws, bs, wa, ba, wo, bo = params
    x = s @ ws + bs
    y = a @ wa + ba
    net = jnp.maximum(x + y, 0.0)
    return net @ wo + bo


if __name__ == "__main__":
    key = jax.random.PRNGKey(0)
    kp, ks, ka = jax.random.split(key, 3)
    params = init_params(kp)

    # Small shapes consistent with the module (s_dim=6, a_dim=4).
    B = 8
    s = jax.random.normal(ks, (B, S_DIM), jnp.float32)
    a = jax.random.normal(ka, (B, A_DIM), jnp.float32)

    out = jax.block_until_ready(cnet_forward(s, a, params))
    ref = cnet_reference(s, a, params)
    assert out.shape == (B, 1)
    assert jnp.allclose(out, ref, atol=1e-4, rtol=1e-4)

    # Second check with a batch that needs padding + more than one grid step.
    B2 = 200
    s2 = jax.random.normal(jax.random.PRNGKey(1), (B2, S_DIM), jnp.float32)
    a2 = jax.random.normal(jax.random.PRNGKey(2), (B2, A_DIM), jnp.float32)
    out2 = jax.block_until_ready(cnet_forward(s2, a2, params, batch_tile=128))
    ref2 = cnet_reference(s2, a2, params)
    assert out2.shape == (B2, 1)
    assert jnp.allclose(out2, ref2, atol=1e-4, rtol=1e-4)

    print("KERNEL_OK")
</pallas_src>

<mosaic_0001>
module attributes {stable_mosaic.version = 11 : i64} {
  func.func @cnet_kernel(%arg0: i32, %arg1: memref<10x128xf32, #tpu.memory_space<vmem>>, %arg2: memref<30x10xf32, #tpu.memory_space<vmem>>, %arg3: memref<30x1xf32, #tpu.memory_space<vmem>>, %arg4: memref<1x30xf32, #tpu.memory_space<vmem>>, %arg5: memref<1x1xf32, #tpu.memory_space<smem>>, %arg6: memref<1x128xf32, #tpu.memory_space<vmem>>) attributes {dimension_semantics = [#tpu.dimension_semantics<parallel>], iteration_bounds = array<i64: 1>, scalar_prefetch = 0 : i64, scratch_operands = 0 : i64, tpu.core_type = #tpu.core_type<tc>, window_params = [{transform_indices = @transform_0, window_bounds = array<i64: 10, 128>}, {pipeline_mode = #tpu.pipeline_mode<synchronous>, transform_indices = @transform_1, window_bounds = array<i64: 30, 10>}, {pipeline_mode = #tpu.pipeline_mode<synchronous>, transform_indices = @transform_2, window_bounds = array<i64: 30, 1>}, {pipeline_mode = #tpu.pipeline_mode<synchronous>, transform_indices = @transform_3, window_bounds = array<i64: 1, 30>}, {transform_indices = @transform_4, window_bounds = array<i64: 1, 1>}, {transform_indices = @transform_5, window_bounds = array<i64: 1, 128>}]} {
    %c0 = arith.constant 0 : index
    %c0_0 = arith.constant 0 : index
    %0 = vector.load %arg2[%c0, %c0_0] : memref<30x10xf32, #tpu.memory_space<vmem>>, vector<30x10xf32>
    %c0_1 = arith.constant 0 : index
    %c0_2 = arith.constant 0 : index
    %1 = vector.load %arg1[%c0_1, %c0_2] : memref<10x128xf32, #tpu.memory_space<vmem>>, vector<10x128xf32>
    %cst = arith.constant dense<0.000000e+00> : vector<30x128xf32>
    %2 = tpu.matmul %0, %1, %cst {dimension_numbers = #tpu.dot_dimension_numbers<[1], [0], [0], [1], [0, 0, 1, 1], [], []>} : vector<30x10xf32>, vector<10x128xf32>, vector<30x128xf32> -> vector<30x128xf32>
    %c0_3 = arith.constant 0 : index
    %c0_4 = arith.constant 0 : index
    %3 = vector.load %arg3[%c0_3, %c0_4] : memref<30x1xf32, #tpu.memory_space<vmem>>, vector<30x1xf32>
    %4 = vector.broadcast %3 : vector<30x1xf32> to vector<30x128xf32>
    %5 = arith.addf %2, %4 : vector<30x128xf32>
    %cst_5 = arith.constant 0.000000e+00 : f32
    %6 = vector.broadcast %cst_5 : f32 to vector<30x128xf32>
    %7 = arith.maximumf %5, %6 : vector<30x128xf32>
    %c0_6 = arith.constant 0 : index
    %c0_7 = arith.constant 0 : index
    %8 = vector.load %arg4[%c0_6, %c0_7] : memref<1x30xf32, #tpu.memory_space<vmem>>, vector<1x30xf32>
    %cst_8 = arith.constant dense<0.000000e+00> : vector<1x128xf32>
    %9 = tpu.matmul %8, %7, %cst_8 {dimension_numbers = #tpu.dot_dimension_numbers<[1], [0], [0], [1], [0, 0, 1, 1], [], []>} : vector<1x30xf32>, vector<30x128xf32>, vector<1x128xf32> -> vector<1x128xf32>
    %c0_9 = arith.constant 0 : index
    %c0_10 = arith.constant 0 : index
    %10 = memref.load %arg5[%c0_9, %c0_10] : memref<1x1xf32, #tpu.memory_space<smem>>
    %11 = vector.broadcast %10 : f32 to vector<1x128xf32>
    %12 = arith.addf %9, %11 : vector<1x128xf32>
    %c0_11 = arith.constant 0 : index
    %c0_12 = arith.constant 0 : index
    %13 = vector.load %arg6[%c0_11, %c0_12] : memref<1x128xf32, #tpu.memory_space<vmem>>, vector<1x128xf32>
    tpu.vector_store %arg6[%c0_11, %c0_12], %12 {strides = array<i32>} : memref<1x128xf32, #tpu.memory_space<vmem>>, vector<1x128xf32>,
    return
  }
  func.func @transform_0(%arg0: i32) -> (i32, i32) {
    %c0_i32 = arith.constant 0 : i32
    %c0_i32_0 = arith.constant 0 : i32
    return %c0_i32, %arg0 : i32, i32
  }
  func.func @transform_1(%arg0: i32) -> (i32, i32) {
    %c0_i32 = arith.constant 0 : i32
    %c0_i32_0 = arith.constant 0 : i32
    %c0_i32_1 = arith.constant 0 : i32
    return %c0_i32, %c0_i32_0 : i32, i32
  }
  func.func @transform_2(%arg0: i32) -> (i32, i32) {
    %c0_i32 = arith.constant 0 : i32
    %c0_i32_0 = arith.constant 0 : i32
    %c0_i32_1 = arith.constant 0 : i32
    return %c0_i32, %c0_i32_0 : i32, i32
  }
  func.func @transform_3(%arg0: i32) -> (i32, i32) {
    %c0_i32 = arith.constant 0 : i32
    %c0_i32_0 = arith.constant 0 : i32
    %c0_i32_1 = arith.constant 0 : i32
    return %c0_i32, %c0_i32_0 : i32, i32
  }
  func.func @transform_4(%arg0: i32) -> (i32, i32) {
    %c0_i32 = arith.constant 0 : i32
    %c0_i32_0 = arith.constant 0 : i32
    %c0_i32_1 = arith.constant 0 : i32
    return %c0_i32, %c0_i32_0 : i32, i32
  }
  func.func @transform_5(%arg0: i32) -> (i32, i32) {
    %c0_i32 = arith.constant 0 : i32
    %c0_i32_0 = arith.constant 0 : i32
    return %c0_i32, %arg0 : i32, i32
  }
}

</mosaic_0001>

<bundles_post_ra>
// kernel: tpu_custom_call.1
= control target key start
LH: loop header
LB: loop body
LE: loop exit
PB: predicated region body
PF: predicated region fallthrough
CT: control target
= control target key end

     0   :  { %vm65_vm0 = vcmask 1041408   ;;  %vm52_vm1 = vcmask 80896   ;;  %v191_v4 = vmov 0   ;;  %s266_s0 = inlined_call_operand.vmem [shape: f32[10,128], index: 0, kind: input, shape index: {}]   ;;  %s267_s1 = inlined_call_operand.vmem [shape: f32[30,10], index: 1, kind: input, shape index: {}]   ;;  %s268_s2 = inlined_call_operand.vmem [shape: f32[30,1], index: 2, kind: input, shape index: {}]   ;;  %s269_s3 = inlined_call_operand.vmem [shape: f32[1,30], index: 3, kind: input, shape index: {}]   ;;  %s270_s4 = inlined_call_operand.<no memory space> [shape: f32[1,1], index: 4, kind: input, shape index: {}]   ;;  %s271_s5 = inlined_call_operand.hbm [shape: f32[1,128], index: 5, kind: output, shape index: {}]  }
   0x1   :  { %v27_v0 = vld [vmem:[%s266_s0 + $0x8] sm:$0x3]  ;;  %v26_v1 = vld [vmem:[%s266_s0] sm:$0xff]  ;;  %v25_v3 = vld [vmem:[%s267_s1 + $0x18] sm:$0x3f]  ;;  %163 = vset.pattern.permute.xlu0 %v191_v4 }
   0x2   :  { %157 = vmatpush.msk.msra.mxu2 %vm65_vm0, %v27_v0  ;;  %158 = vmatpush.msk.msra.mxu3 %vm65_vm0, %v27_v0  ;;  %v23_v2 = vld [vmem:[%s267_s1 + $0x8] sm:$0xff]  ;;  %v31_v5 = vld [vmem:[%s268_s2 + $0x18] sm:$0x3f]  ;;  %v22_v6 = vld [vmem:[%s267_s1] sm:$0xff] }
   0x3   :  { %150 = vmatpush.msk.msra.mxu0 %vm65_vm0, %v27_v0 }
   0x4   :  { %159 = vmatpush.msra.mxu2 %v26_v1  ;;  %160 = vmatpush.msra.mxu3 %v26_v1 }
   0x5   :  { %11 = vsyncpa [#allocation4], 0  ;;  %152 = vmatmul.msk.f32.vlgmr.msra.gmra.mxu2 %vm52_vm1, %v23_v2  ;;  %154 = vmatmul.msk.f32.vlgmr.msra.gmra.mxu3 %vm52_vm1, %v25_v3  ;;  %v29_v7 = vld [vmem:[%s268_s2 + $0x8] sm:$0xff]  ;;  %v24_v8 = vld [vmem:[%s267_s1 + $0x10] sm:$0xff]  ;;  %vm109_vm2 = vcmask 1045504   ;;  %vm105_vm3 = vcmask 244736   ;;  %v104_v28 = vstv %s270_s4 }
   0x6   :  { %49 = vperm.xlu0 %163, %v31_v5   ;;  %84 = vmatpush.msra.mxu0 %v26_v1  ;;  %v30_v9 = vld [vmem:[%s268_s2 + $0x10] sm:$0xff]  ;;  %v28_v10 = vld [vmem:[%s268_s2] sm:$0xff]  ;;  %s192_s14 = smov [#allocation3]   ;;  %s141_s18 = sshll.u32 %s271_s5, 4  ;;  %s142_s18 = int_to_ptr.hbm [resolvable:$true] %s141_s18 }
   0x7   :  { %151 = vmatmul.msk.f32.vlgmr.msra.gmra.mxu0 %vm52_vm1, %v22_v6  ;;  %164 = vset.pattern.permute.xlu1 %v191_v4  ;;  %v102_v27 = vld [vmem:[%s269_s3] sm:$0x1]  ;;  %s139_s15 = sshll.u32 %s192_s14, 4  ;;  %s140_s15 = int_to_ptr.vmem [resolvable:$true] %s139_s15 }
   0x8   :  { %39 = vperm.xlu1 %164, %v29_v7  }
   0xd   :  { %153 = vmatmul.msk.f32.gmra.mxu2 %vm52_vm1, %v24_v8 }
   0xe   :  { %44 = vperm.xlu0 %163, %v30_v9  }
  0x10   :  { %34 = vperm.xlu1 %164, %v28_v10  }
  0x78   :  { %v50_v11 = vpop.permute.xlu0 %49 }
  0x7a   :  { %v40_v12 = vpop.permute.xlu1 %39 }
  0x80   :  { %v45_v17 = vpop.permute.xlu0 %44 }
  0x82   :  { %v35_v18 = vpop.permute.xlu1 %34 }
  0x84   :  { %v86_v19 = vpop.f32.mrf.mxu0 }
  0x85   :  { %v87_v23 = vadd.f32 %v86_v19, %v35_v18 }
  0x87   :  { %v98_v26 = vmax.f32 %v87_v23, 0.0 }
  0x88   :  { %v89_v13 = vpop.f32.mrf.mxu2  ;;  %v95_v14 = vpop.f32.mrf.mxu3 }
  0x89   :  { %v96_v15 = vadd.f32 %v95_v14, %v50_v11  ;;  %v90_v21 = vadd.f32 %v89_v13, %v40_v12 }
  0x8b   :  { %v101_v16 = vmax.f32 %v96_v15, 0.0  ;;  %v99_v25 = vmax.f32 %v90_v21, 0.0 }
  0x8d   :  { %155 = vmatpush.msk.msra.mxu1 %vm109_vm2, %v101_v16 }
  0x90   :  { %v92_v20 = vpop.f32.mrf.mxu2 }
  0x91   :  { %v93_v22 = vadd.f32 %v92_v20, %v45_v17 }
  0x93   :  { %v100_v24 = vmax.f32 %v93_v22, 0.0 }
  0x95   :  { %126 = vmatpush.msra.mxu1 %v100_v24 }
  0x97   :  { %127 = vmatpush.msra.mxu1 %v99_v25 }
  0x99   :  { %128 = vmatpush.msra.mxu1 %v98_v26 }
  0x9a   :  { %156 = vmatmul.msk.f32.vlgmr.msra.gmra.mxu1 %vm105_vm3, %v102_v27 }
 0x117   :  { %v130_v29 = vpop.f32.mrf.mxu1 }
 0x118   :  { %v131_v30 = vadd.f32 %v130_v29, %v104_v28 }
 0x11a   :  { %133 = vst [vmem:[#allocation3] sm:$0x1] %v131_v30 }
 0x11b   :  { %144 = dma.vmem_to_hbm [thread:$0]  %s140_s15, 16, %s142_s18, [#allocation4]  }
 0x11c   :  { %189 = dma.done.wait [#allocation4], 16  }
 0x11d   :  { %190 = vsyncadd [#allocation4], 4294967280 }
 0x11e   :  { %149 = vsyncpa [#allocation4], 1 }

</bundles_post_ra>
